<compile_context>
chip_gen: v6e
topology: v6e:2x2x1
jax: 0.10.0
libtpu: 0.0.40
codegen_flags: <defaults>
</compile_context>

<pallas_src>
import functools

import jax
import jax.numpy as jnp
from jax.experimental import pallas as pl
from jax.experimental.pallas import tpu as pltpu


def emb_size(card):
    return min(50, round(1.6 * card ** 0.25))


def _round_up(x, m):
    return ((x + m - 1) // m) * m


# ----------------------------- Pallas kernel ------------------------------- #
def _mlp_kernel(offsets,
                xc_ref, xn_ref,
                w1_ref, b1_ref, w2_ref, b2_ref,
                w3_ref, b3_ref, w4_ref, b4_ref,
                o_ref):
    tb, d1 = xn_ref.shape

    # Fused categorical embedding: synthesize one-hot lanes via an iota compare
    # against the (statically offset) category ids.  The matching rows of w1
    # were pre-multiplied by the embedding tables in the wrapper.
    ids = xc_ref[...]                                          # (tb, n_cat) i32
    lane = jax.lax.broadcasted_iota(jnp.int32, (tb, d1), 1)
    hit = lane == (ids[:, 0:1] + offsets[0])
    for i in range(1, len(offsets)):
        hit = jnp.logical_or(hit, lane == (ids[:, i:i + 1] + offsets[i]))
    onehot = jnp.where(hit, 1.0, 0.0).astype(xn_ref.dtype)
    x = xn_ref[...] + onehot                                   # (tb, d1) bf16

    # 3x [Linear + folded BN + ReLU]: bf16 MXU operands, f32 accum + epilogue.
    h = jnp.dot(x, w1_ref[...], preferred_element_type=jnp.float32) + b1_ref[...]
    h = jnp.maximum(h, 0.0).astype(w2_ref.dtype)
    h = jnp.dot(h, w2_ref[...], preferred_element_type=jnp.float32) + b2_ref[...]
    h = jnp.maximum(h, 0.0).astype(w3_ref.dtype)
    h = jnp.dot(h, w3_ref[...], preferred_element_type=jnp.float32) + b3_ref[...]
    h = jnp.maximum(h, 0.0).astype(w4_ref.dtype)

    # Final Linear -> lane-dense [tb, 128] block (real output is column 0).
    o_ref[...] = (jnp.dot(h, w4_ref[...], preferred_element_type=jnp.float32)
                  + b4_ref[...]).astype(o_ref.dtype)


# ------------------------- parameter folding (wrapper) --------------------- #
def _fold_params(params, compute_dtype=jnp.bfloat16):
    """Fold embeddings into W1 rows, BN into per-column scale/shift, and pad
    the 64-wide hidden layer / 1-wide output to 128 lanes."""
    emb = params["emb"]
    (w1, b1), (w2, b2), (w3, b3), (w4, b4) = params["lin"]
    (s1, t1), (s2, t2), (s3, t3) = params["bn"]

    emb_dims = [t.shape[1] for t in emb]
    n_num = w1.shape[0] - sum(emb_dims)

    blocks, offsets = [], []
    row, off = 0, 0
    for tbl, e in zip(emb, emb_dims):
        blocks.append(tbl @ w1[row:row + e, :])        # (card_i, 256) folded
        offsets.append(off)
        off += tbl.shape[0]
        row += e
    num_off = off                                      # numeric lanes start here
    blocks.append(w1[row:row + n_num, :])              # numeric rows of W1
    w1_big = jnp.concatenate(blocks, axis=0)           # (sum_cards + n_num, 256)

    d1 = max(128, _round_up(w1_big.shape[0], 128))     # lane-dense layer-1 input
    w1_big = jnp.pad(w1_big, ((0, d1 - w1_big.shape[0]), (0, 0)))

    hpad = 128                                         # pad 64-wide layer & output
    w1f = w1_big * s1
    b1f = b1 * s1 + t1
    w2f = w2 * s2
    b2f = b2 * s2 + t2
    w3f = jnp.pad(w3 * s3, ((0, 0), (0, hpad - w3.shape[1])))
    b3f = jnp.pad(b3 * s3 + t3, ((0, 0), (0, hpad - b3.shape[1])))
    w4f = jnp.pad(w4, ((0, hpad - w4.shape[0]), (0, hpad - w4.shape[1])))
    b4f = jnp.pad(b4, ((0, 0), (0, hpad - b4.shape[1])))

    ws = tuple(a.astype(compute_dtype) for a in (w1f, w2f, w3f, w4f))
    bs = tuple(a.astype(jnp.float32) for a in (b1f, b2f, b3f, b4f))
    return ws, bs, tuple(offsets), num_off, n_num


def surgery_net_forward(xn, xc, params):
    """Eval-mode forward. xn: [B, n_num] float, xc: [B, n_cat] int."""
    B = xn.shape[0]
    n_cat = xc.shape[1]

    ws, bs, offsets, num_off, n_num = _fold_params(params)
    w1f, w2f, w3f, w4f = ws
    b1f, b2f, b3f, b4f = bs
    d1 = w1f.shape[0]
    hout = w4f.shape[1]

    # Batch tiling: tile is a multiple of 8 (sublanes), capped at 512; pad the
    # batch so the grid divides evenly (no silently dropped rows).
    TB = min(512, _round_up(B, 8))
    B_pad = _round_up(B, TB)
    grid = B_pad // TB

    # Numeric features land in lanes [num_off, num_off + n_num) of a d1-wide
    # lane-dense slab; the categorical one-hot lanes are built in-kernel.
    xn_slab = jnp.pad(xn.astype(jnp.bfloat16),
                      ((0, B_pad - B), (num_off, d1 - num_off - n_num)))
    xc_pad = jnp.pad(xc.astype(jnp.int32), ((0, B_pad - B), (0, 0)))

    flops = 2 * B_pad * (d1 * w1f.shape[1] + w2f.shape[0] * w2f.shape[1]
                         + w3f.shape[0] * w3f.shape[1] + w4f.shape[0] * hout)
    bytes_accessed = (int(xc_pad.size) * 4 + int(xn_slab.size) * 2
                      + sum(int(w.size) * 2 for w in ws)
                      + sum(int(b.size) * 4 for b in bs)
                      + B_pad * hout * 4)

    def const_spec(a):
        return pl.BlockSpec(a.shape, lambda i: (0, 0))

    out = pl.pallas_call(
        functools.partial(_mlp_kernel, offsets),
        out_shape=jax.ShapeDtypeStruct((B_pad, hout), jnp.float32),
        grid_spec=pltpu.PrefetchScalarGridSpec(
            num_scalar_prefetch=0,
            grid=(grid,),
            in_specs=[pl.BlockSpec((TB, n_cat), lambda i: (i, 0)),
                      pl.BlockSpec((TB, d1), lambda i: (i, 0)),
                      const_spec(w1f), const_spec(b1f),
                      const_spec(w2f), const_spec(b2f),
                      const_spec(w3f), const_spec(b3f),
                      const_spec(w4f), const_spec(b4f)],
            out_specs=pl.BlockSpec((TB, hout), lambda i: (i, 0)),
        ),
        compiler_params=pltpu.CompilerParams(
            dimension_semantics=("parallel",)),
        cost_estimate=pl.CostEstimate(
            flops=flops, transcendentals=0, bytes_accessed=bytes_accessed),
    )(xc_pad, xn_slab, w1f, b1f, w2f, b2f, w3f, b3f, w4f, b4f)

    # Strip batch padding and the lane padding on the 1-wide output.
    return out[:B, :1]


def _reference_folded(xn, xc, params):
    """Pure-JAX mirror of the exact kernel math (folded BN/emb, bf16 matmuls)."""
    ws, bs, offsets, num_off, n_num = _fold_params(params)
    d1 = ws[0].shape[0]
    x = jnp.pad(xn.astype(jnp.float32),
                ((0, 0), (num_off, d1 - num_off - n_num)))
    for i, off in enumerate(offsets):
        x = x + jax.nn.one_hot(xc[:, i] + off, d1, dtype=jnp.float32)
    h = x.astype(jnp.bfloat16)
    for w, b in zip(ws[:3], bs[:3]):
        h = jnp.maximum(
            jnp.dot(h, w, preferred_element_type=jnp.float32) + b,
            0.0).astype(jnp.bfloat16)
    out = jnp.dot(h, ws[3], preferred_element_type=jnp.float32) + bs[3]
    return out[:, :1]


# --------------------------- parameter construction ------------------------ #
def init_params(n_num, cat_dims, emb_factor, seed=0):
    emb_dims = [max(1, int(emb_size(c) * emb_factor)) for c in cat_dims]
    in_dim = sum(emb_dims) + n_num

    key = jax.random.PRNGKey(seed)
    keys = iter(jax.random.split(key, 32))

    emb = [jax.random.normal(next(keys), (c, e), dtype=jnp.float32)
           for c, e in zip(cat_dims, emb_dims)]

    # Linear layers stored as [in, out] (transpose of nn.Linear.weight).
    dims = [in_dim, 256, 128, 64, 1]
    lin = []
    for din, dout in zip(dims[:-1], dims[1:]):
        w = jax.random.normal(next(keys), (din, dout), dtype=jnp.float32)
        w = w * (1.0 / jnp.sqrt(jnp.float32(din)))
        b = 0.01 * jax.random.normal(next(keys), (1, dout), dtype=jnp.float32)
        lin.append((w, b))

    # BatchNorm1d at default init, folded to eval-mode per-feature scale/shift.
    eps = 1e-5
    bn = []
    for h in (256, 128, 64):
        gamma = jnp.ones((1, h), jnp.float32)
        beta = jnp.zeros((1, h), jnp.float32)
        rmean = jnp.zeros((1, h), jnp.float32)
        rvar = jnp.ones((1, h), jnp.float32)
        s = gamma / jnp.sqrt(rvar + eps)
        t = beta - rmean * s
        bn.append((s, t))

    return {"emb": emb, "lin": lin, "bn": bn}, emb_dims


# --------------------------------- main ------------------------------------ #
if __name__ == "__main__":
    n_num = 6
    cat_dims = [10, 20, 7]
    emb_factor = 1.0
    dropout = 0.1  # identity at inference
    B = 8

    params, emb_dims = init_params(n_num, cat_dims, emb_factor, seed=0)

    key = jax.random.PRNGKey(0)
    k_xn, k_xc = jax.random.split(key)
    xn = jax.random.normal(k_xn, (B, n_num), dtype=jnp.float32)
    xc = jnp.stack(
        [jax.random.randint(jax.random.fold_in(k_xc, i), (B,), 0, c)
         for i, c in enumerate(cat_dims)], axis=1).astype(jnp.int32)

    out = surgery_net_forward(xn, xc, params)
    out = jax.block_until_ready(out)
    assert out.shape == (B, 1) and out.dtype == jnp.float32

    # Check 1 (tight): pure-JAX mirror of the kernel's folded bf16 math.
    ref_folded = _reference_folded(xn, xc, params)
    assert jnp.allclose(out, ref_folded, atol=1e-3, rtol=1e-3)

    # Check 2 (semantic): original eval-mode SurgeryNet math in f32; loose
    # tolerance absorbs the bf16 matmul operands used in the kernel.
    embs = [params["emb"][i][xc[:, i]] for i in range(len(cat_dims))]
    h = jnp.concatenate(embs + [xn], axis=1)
    for (w, b), (s, t) in zip(params["lin"][:3], params["bn"]):
        h = jnp.maximum((h @ w + b) * s + t, 0.0)
    ref = h @ params["lin"][3][0] + params["lin"][3][1]
    assert jnp.allclose(out, ref, atol=5e-2, rtol=5e-2)

    print("KERNEL_OK")
</pallas_src>

<mosaic_0001>
module attributes {stable_mosaic.version = 11 : i64} {
  func.func @_mlp_kernel(%arg0: i32, %arg1: memref<8x3xi32, #tpu.memory_space<vmem>>, %arg2: memref<8x128xbf16, #tpu.memory_space<vmem>>, %arg3: memref<128x256xbf16, #tpu.memory_space<vmem>>, %arg4: memref<1x256xf32, #tpu.memory_space<vmem>>, %arg5: memref<256x128xbf16, #tpu.memory_space<vmem>>, %arg6: memref<1x128xf32, #tpu.memory_space<vmem>>, %arg7: memref<128x128xbf16, #tpu.memory_space<vmem>>, %arg8: memref<1x128xf32, #tpu.memory_space<vmem>>, %arg9: memref<128x128xbf16, #tpu.memory_space<vmem>>, %arg10: memref<1x128xf32, #tpu.memory_space<vmem>>, %arg11: memref<8x128xf32, #tpu.memory_space<vmem>>) attributes {dimension_semantics = [#tpu.dimension_semantics<parallel>], iteration_bounds = array<i64: 1>, scalar_prefetch = 0 : i64, scratch_operands = 0 : i64, tpu.core_type = #tpu.core_type<tc>, window_params = [{transform_indices = @transform_0, window_bounds = array<i64: 8, 3>}, {transform_indices = @transform_1, window_bounds = array<i64: 8, 128>}, {pipeline_mode = #tpu.pipeline_mode<synchronous>, transform_indices = @transform_2, window_bounds = array<i64: 128, 256>}, {pipeline_mode = #tpu.pipeline_mode<synchronous>, transform_indices = @transform_3, window_bounds = array<i64: 1, 256>}, {pipeline_mode = #tpu.pipeline_mode<synchronous>, transform_indices = @transform_4, window_bounds = array<i64: 256, 128>}, {pipeline_mode = #tpu.pipeline_mode<synchronous>, transform_indices = @transform_5, window_bounds = array<i64: 1, 128>}, {pipeline_mode = #tpu.pipeline_mode<synchronous>, transform_indices = @transform_6, window_bounds = array<i64: 128, 128>}, {pipeline_mode = #tpu.pipeline_mode<synchronous>, transform_indices = @transform_7, window_bounds = array<i64: 1, 128>}, {pipeline_mode = #tpu.pipeline_mode<synchronous>, transform_indices = @transform_8, window_bounds = array<i64: 128, 128>}, {pipeline_mode = #tpu.pipeline_mode<synchronous>, transform_indices = @transform_9, window_bounds = array<i64: 1, 128>}, {transform_indices = @transform_10, window_bounds = array<i64: 8, 128>}]} {
    %c0 = arith.constant 0 : index
    %c0_0 = arith.constant 0 : index
    %0 = vector.load %arg1[%c0, %c0_0] : memref<8x3xi32, #tpu.memory_space<vmem>>, vector<8x3xi32>
    %1 = tpu.iota {dimensions = array<i32: 1>} : vector<8x128xi32>
    %2 = vector.extract_strided_slice %0 {offsets = [0, 0], sizes = [8, 1], strides = [1, 1]} : vector<8x3xi32> to vector<8x1xi32>
    %c0_i32 = arith.constant 0 : i32
    %3 = vector.broadcast %c0_i32 : i32 to vector<8x1xi32>
    %4 = arith.addi %2, %3 : vector<8x1xi32>
    %5 = vector.broadcast %4 : vector<8x1xi32> to vector<8x128xi32>
    %6 = arith.cmpi eq, %1, %5 : vector<8x128xi32>
    %7 = vector.extract_strided_slice %0 {offsets = [0, 1], sizes = [8, 1], strides = [1, 1]} : vector<8x3xi32> to vector<8x1xi32>
    %c10_i32 = arith.constant 10 : i32
    %8 = vector.broadcast %c10_i32 : i32 to vector<8x1xi32>
    %9 = arith.addi %7, %8 : vector<8x1xi32>
    %10 = vector.broadcast %9 : vector<8x1xi32> to vector<8x128xi32>
    %11 = arith.cmpi eq, %1, %10 : vector<8x128xi32>
    %12 = arith.ori %6, %11 : vector<8x128xi1>
    %13 = vector.extract_strided_slice %0 {offsets = [0, 2], sizes = [8, 1], strides = [1, 1]} : vector<8x3xi32> to vector<8x1xi32>
    %c30_i32 = arith.constant 30 : i32
    %14 = vector.broadcast %c30_i32 : i32 to vector<8x1xi32>
    %15 = arith.addi %13, %14 : vector<8x1xi32>
    %16 = vector.broadcast %15 : vector<8x1xi32> to vector<8x128xi32>
    %17 = arith.cmpi eq, %1, %16 : vector<8x128xi32>
    %18 = arith.ori %12, %17 : vector<8x128xi1>
    %cst = arith.constant 1.000000e+00 : f32
    %cst_1 = arith.constant 0.000000e+00 : f32
    %19 = vector.broadcast %cst : f32 to vector<8x128xf32>
    %20 = vector.broadcast %cst_1 : f32 to vector<8x128xf32>
    %21 = arith.select %18, %19, %20 : vector<8x128xi1>, vector<8x128xf32>
    %22 = arith.truncf %21 : vector<8x128xf32> to vector<8x128xbf16>
    %c0_2 = arith.constant 0 : index
    %c0_3 = arith.constant 0 : index
    %23 = vector.load %arg2[%c0_2, %c0_3] : memref<8x128xbf16, #tpu.memory_space<vmem>>, vector<8x128xbf16>
    %24 = arith.addf %23, %22 : vector<8x128xbf16>
    %c0_4 = arith.constant 0 : index
    %c0_5 = arith.constant 0 : index
    %25 = vector.load %arg3[%c0_4, %c0_5] : memref<128x256xbf16, #tpu.memory_space<vmem>>, vector<128x256xbf16>
    %cst_6 = arith.constant dense<0.000000e+00> : vector<8x256xf32>
    %26 = tpu.matmul %24, %25, %cst_6 {dimension_numbers = #tpu.dot_dimension_numbers<[1], [0], [0], [1], [0, 0, 1, 1], [], []>} : vector<8x128xbf16>, vector<128x256xbf16>, vector<8x256xf32> -> vector<8x256xf32>
    %c0_7 = arith.constant 0 : index
    %c0_8 = arith.constant 0 : index
    %27 = vector.load %arg4[%c0_7, %c0_8] : memref<1x256xf32, #tpu.memory_space<vmem>>, vector<1x256xf32>
    %28 = vector.broadcast %27 : vector<1x256xf32> to vector<8x256xf32>
    %29 = arith.addf %26, %28 : vector<8x256xf32>
    %cst_9 = arith.constant 0.000000e+00 : f32
    %30 = vector.broadcast %cst_9 : f32 to vector<8x256xf32>
    %31 = arith.maximumf %29, %30 : vector<8x256xf32>
    %32 = arith.truncf %31 : vector<8x256xf32> to vector<8x256xbf16>
    %c0_10 = arith.constant 0 : index
    %c0_11 = arith.constant 0 : index
    %33 = vector.load %arg5[%c0_10, %c0_11] : memref<256x128xbf16, #tpu.memory_space<vmem>>, vector<256x128xbf16>
    %cst_12 = arith.constant dense<0.000000e+00> : vector<8x128xf32>
    %34 = tpu.matmul %32, %33, %cst_12 {dimension_numbers = #tpu.dot_dimension_numbers<[1], [0], [0], [1], [0, 0, 1, 1], [], []>} : vector<8x256xbf16>, vector<256x128xbf16>, vector<8x128xf32> -> vector<8x128xf32>
    %c0_13 = arith.constant 0 : index
    %c0_14 = arith.constant 0 : index
    %35 = vector.load %arg6[%c0_13, %c0_14] : memref<1x128xf32, #tpu.memory_space<vmem>>, vector<1x128xf32>
    %36 = vector.broadcast %35 : vector<1x128xf32> to vector<8x128xf32>
    %37 = arith.addf %34, %36 : vector<8x128xf32>
    %cst_15 = arith.constant 0.000000e+00 : f32
    %38 = vector.broadcast %cst_15 : f32 to vector<8x128xf32>
    %39 = arith.maximumf %37, %38 : vector<8x128xf32>
    %40 = arith.truncf %39 : vector<8x128xf32> to vector<8x128xbf16>
    %c0_16 = arith.constant 0 : index
    %c0_17 = arith.constant 0 : index
    %41 = vector.load %arg7[%c0_16, %c0_17] : memref<128x128xbf16, #tpu.memory_space<vmem>>, vector<128x128xbf16>
    %cst_18 = arith.constant dense<0.000000e+00> : vector<8x128xf32>
    %42 = tpu.matmul %40, %41, %cst_18 {dimension_numbers = #tpu.dot_dimension_numbers<[1], [0], [0], [1], [0, 0, 1, 1], [], []>} : vector<8x128xbf16>, vector<128x128xbf16>, vector<8x128xf32> -> vector<8x128xf32>
    %c0_19 = arith.constant 0 : index
    %c0_20 = arith.constant 0 : index
    %43 = vector.load %arg8[%c0_19, %c0_20] : memref<1x128xf32, #tpu.memory_space<vmem>>, vector<1x128xf32>
    %44 = vector.broadcast %43 : vector<1x128xf32> to vector<8x128xf32>
    %45 = arith.addf %42, %44 : vector<8x128xf32>
    %cst_21 = arith.constant 0.000000e+00 : f32
    %46 = vector.broadcast %cst_21 : f32 to vector<8x128xf32>
    %47 = arith.maximumf %45, %46 : vector<8x128xf32>
    %48 = arith.truncf %47 : vector<8x128xf32> to vector<8x128xbf16>
    %c0_22 = arith.constant 0 : index
    %c0_23 = arith.constant 0 : index
    %49 = vector.load %arg9[%c0_22, %c0_23] : memref<128x128xbf16, #tpu.memory_space<vmem>>, vector<128x128xbf16>
    %cst_24 = arith.constant dense<0.000000e+00> : vector<8x128xf32>
    %50 = tpu.matmul %48, %49, %cst_24 {dimension_numbers = #tpu.dot_dimension_numbers<[1], [0], [0], [1], [0, 0, 1, 1], [], []>} : vector<8x128xbf16>, vector<128x128xbf16>, vector<8x128xf32> -> vector<8x128xf32>
    %c0_25 = arith.constant 0 : index
    %c0_26 = arith.constant 0 : index
    %51 = vector.load %arg10[%c0_25, %c0_26] : memref<1x128xf32, #tpu.memory_space<vmem>>, vector<1x128xf32>
    %52 = vector.broadcast %51 : vector<1x128xf32> to vector<8x128xf32>
    %53 = arith.addf %50, %52 : vector<8x128xf32>
    %c0_27 = arith.constant 0 : index
    %c0_28 = arith.constant 0 : index
    %54 = vector.load %arg11[%c0_27, %c0_28] : memref<8x128xf32, #tpu.memory_space<vmem>>, vector<8x128xf32>
    tpu.vector_store %arg11[%c0_27, %c0_28], %53 {strides = array<i32>} : memref<8x128xf32, #tpu.memory_space<vmem>>, vector<8x128xf32>,
    return
  }
  func.func @transform_0(%arg0: i32) -> (i32, i32) {
    %c0_i32 = arith.constant 0 : i32
    %c0_i32_0 = arith.constant 0 : i32
    return %arg0, %c0_i32 : i32, i32
  }
  func.func @transform_1(%arg0: i32) -> (i32, i32) {
    %c0_i32 = arith.constant 0 : i32
    %c0_i32_0 = arith.constant 0 : i32
    return %arg0, %c0_i32 : i32, i32
  }
  func.func @transform_2(%arg0: i32) -> (i32, i32) {
    %c0_i32 = arith.constant 0 : i32
    %c0_i32_0 = arith.constant 0 : i32
    %c0_i32_1 = arith.constant 0 : i32
    return %c0_i32, %c0_i32_0 : i32, i32
  }
  func.func @transform_3(%arg0: i32) -> (i32, i32) {
    %c0_i32 = arith.constant 0 : i32
    %c0_i32_0 = arith.constant 0 : i32
    %c0_i32_1 = arith.constant 0 : i32
    return %c0_i32, %c0_i32_0 : i32, i32
  }
  func.func @transform_4(%arg0: i32) -> (i32, i32) {
    %c0_i32 = arith.constant 0 : i32
    %c0_i32_0 = arith.constant 0 : i32
    %c0_i32_1 = arith.constant 0 : i32
    return %c0_i32, %c0_i32_0 : i32, i32
  }
  func.func @transform_5(%arg0: i32) -> (i32, i32) {
    %c0_i32 = arith.constant 0 : i32
    %c0_i32_0 = arith.constant 0 : i32
    %c0_i32_1 = arith.constant 0 : i32
    return %c0_i32, %c0_i32_0 : i32, i32
  }
  func.func @transform_6(%arg0: i32) -> (i32, i32) {
    %c0_i32 = arith.constant 0 : i32
    %c0_i32_0 = arith.constant 0 : i32
    %c0_i32_1 = arith.constant 0 : i32
    return %c0_i32, %c0_i32_0 : i32, i32
  }
  func.func @transform_7(%arg0: i32) -> (i32, i32) {
    %c0_i32 = arith.constant 0 : i32
    %c0_i32_0 = arith.constant 0 : i32
    %c0_i32_1 = arith.constant 0 : i32
    return %c0_i32, %c0_i32_0 : i32, i32
  }
  func.func @transform_8(%arg0: i32) -> (i32, i32) {
    %c0_i32 = arith.constant 0 : i32
    %c0_i32_0 = arith.constant 0 : i32
    %c0_i32_1 = arith.constant 0 : i32
    return %c0_i32, %c0_i32_0 : i32, i32
  }
  func.func @transform_9(%arg0: i32) -> (i32, i32) {
    %c0_i32 = arith.constant 0 : i32
    %c0_i32_0 = arith.constant 0 : i32
    %c0_i32_1 = arith.constant 0 : i32
    return %c0_i32, %c0_i32_0 : i32, i32
  }
  func.func @transform_10(%arg0: i32) -> (i32, i32) {
    %c0_i32 = arith.constant 0 : i32
    %c0_i32_0 = arith.constant 0 : i32
    return %arg0, %c0_i32 : i32, i32
  }
}

</mosaic_0001>

<bundles_post_ra>
// kernel: tpu_custom_call.1
= control target key start
LH: loop header
LB: loop body
LE: loop exit
PB: predicated region body
PF: predicated region fallthrough
CT: control target
= control target key end

     0   :  { %15 = vsyncpa [#allocation3], 0  ;;  %s1130_s0 = inlined_call_operand.vmem [shape: s32[8,3], index: 0, kind: input, shape index: {}]   ;;  %s1131_s1 = inlined_call_operand.vmem [shape: bf16[8,128], index: 1, kind: input, shape index: {}]   ;;  %s1132_s2 = inlined_call_operand.hbm [shape: bf16[128,256], index: 2, kind: input, shape index: {}]   ;;  %s1133_s3 = inlined_call_operand.vmem [shape: f32[1,256], index: 3, kind: input, shape index: {}]   ;;  %s1134_s4 = inlined_call_operand.hbm [shape: bf16[256,128], index: 4, kind: input, shape index: {}]   ;;  %s1135_s5 = inlined_call_operand.vmem [shape: f32[1,128], index: 5, kind: input, shape index: {}]   ;;  %s1136_s6 = inlined_call_operand.hbm [shape: bf16[128,128], index: 6, kind: input, shape index: {}]   ;;  %s1137_s7 = inlined_call_operand.vmem [shape: f32[1,128], index: 7, kind: input, shape index: {}]   ;;  %s1138_s8 = inlined_call_operand.hbm [shape: bf16[128,128], index: 8, kind: input, shape index: {}]   ;;  %s1139_s9 = inlined_call_operand.vmem [shape: f32[1,128], index: 9, kind: input, shape index: {}]   ;;  %s1140_s10 = inlined_call_operand.hbm [shape: f32[8,128], index: 10, kind: output, shape index: {}]  }
   0x1   :  { %16 = vsyncpa [#allocation6], 0 }
   0x2   :  { %17 = vsyncpa [#allocation9], 0 }
   0x3   :  { %18 = vsyncpa [#allocation4], 0  ;;  %s1000_s13 = smov [#allocation5]  }
   0x4   :  { %s42_s14 = sshll.u32 %s1000_s13, 4  ;;  %s43_s14 = int_to_ptr.vmem [resolvable:$true] %s42_s14 }
   0x5   :  { %s900_s15 = scalar_lea.vmem %s43_s14, 2048  ;;  %p905_p1 = scmp.lt.s32.totalorder %s43_s14, %s43_s14 }
   0x6   :  { %p901_p0 = scmp.ne.s32.totalorder %s43_s14, %s900_s15  ;;  %p906_p2 = scmp.lt.s32.totalorder %s900_s15, %s900_s15 }
   0x8   :  { %p907_p3 = por %p906_p2, %p905_p1 }
   0xa   :  { %p908_p4 = pnand %p907_p3, %p901_p0 }
   0xc   :  { %911 = shalt.err (!%p908_p4)
}
   0xd   :  { %s1001_s16 = smov 64   ;;  %s1002_s17 = smov 4  }
   0xe   :  { %48 = dma.hbm_to_vmem [thread:$0]  %s1134_s4, 2048, %s43_s14, [#allocation6], %s1001_s16, %s1001_s16, %s1002_s17  }
   0xf   :  { %s1003_s20 = smov [#allocation2]  }
  0x10   :  { %s28_s21 = sshll.u32 %s1003_s20, 4  ;;  %s29_s21 = int_to_ptr.vmem [resolvable:$true] %s28_s21 }
  0x11   :  { %s920_s22 = scalar_lea.vmem %s29_s21, 2048  ;;  %p925_p6 = scmp.lt.s32.totalorder %s29_s21, %s29_s21 }
  0x12   :  { %p921_p5 = scmp.ne.s32.totalorder %s29_s21, %s920_s22  ;;  %p926_p7 = scmp.lt.s32.totalorder %s920_s22, %s920_s22 }
  0x14   :  { %p927_p8 = por %p926_p7, %p925_p6 }
  0x16   :  { %p928_p9 = pnand %p927_p8, %p921_p5 }
  0x18   :  { %931 = shalt.err (!%p928_p9)
}
  0x19   :  { %s1004_s23 = smov 128   ;;  %s1005_s24 = smov 8  }
  0x1a   :  { %34 = dma.hbm_to_vmem [thread:$0]  %s1132_s2, 2048, %s29_s21, [#allocation3], %s1004_s23, %s1004_s23, %s1005_s24  }
  0x1b   :  { %s1006_s27 = smov [#allocation7]   ;;  %s1007_s29 = smov [#allocation8]  }
  0x1c   :  { %s56_s28 = sshll.u32 %s1006_s27, 4  ;;  %s70_s4 = sshll.u32 %s1007_s29, 4  ;;  %s57_s28 = int_to_ptr.vmem [resolvable:$true] %s56_s28  ;;  %s71_s4 = int_to_ptr.vmem [resolvable:$true] %s70_s4 }
  0x1d   :  { %s940_s30 = scalar_lea.vmem %s57_s28, 1024  ;;  %p945_p11 = scmp.lt.s32.totalorder %s57_s28, %s57_s28 }
  0x1e   :  { %p941_p10 = scmp.ne.s32.totalorder %s57_s28, %s940_s30  ;;  %p946_p12 = scmp.lt.s32.totalorder %s940_s30, %s940_s30 }
  0x20   :  { %p947_p13 = por %p946_p12, %p945_p11 }
  0x22   :  { %p948_p0 = pnand %p947_p13, %p941_p10 }
  0x24   :  { %951 = shalt.err (!%p948_p0)
}
  0x25   :  { %62 = dma.hbm_to_vmem [thread:$0]  %s1136_s6, 1024, %s57_s28, [#allocation6], %s1001_s16, %s1001_s16, %s1002_s17  }
  0x26   :  { %s960_s2 = scalar_lea.vmem %s71_s4, 1024  ;;  %p965_p2 = scmp.lt.s32.totalorder %s71_s4, %s71_s4 }
  0x27   :  { %p961_p1 = scmp.ne.s32.totalorder %s71_s4, %s960_s2  ;;  %p966_p3 = scmp.lt.s32.totalorder %s960_s2, %s960_s2 }
  0x29   :  { %p967_p4 = por %p966_p3, %p965_p2 }
  0x2b   :  { %p968_p5 = pnand %p967_p4, %p961_p1 }
  0x2d   :  { %971 = shalt.err (!%p968_p5)
}
  0x2e   :  { %76 = dma.hbm_to_vmem [thread:$0]  %s1138_s8, 1024, %s71_s4, [#allocation9], %s1001_s16, %s1001_s16, %s1002_s17  }
  0x2f   :  { %992 = dma.done.wait [#allocation3], 2048  }
  0x30   :  { %993 = vsyncadd [#allocation3], 4294965248 }
  0x31   :  { %994 = dma.done.wait [#allocation6], 3072  }
  0x32   :  { %995 = vsyncadd [#allocation6], 4294964224 }
  0x33   :  { %996 = dma.done.wait [#allocation9], 1024  }
  0x34   :  { %997 = vsyncadd [#allocation9], 4294966272  ;;  %v1008_v0 = vmov 0   ;;  %v1009_v1 = vmov 2   ;;  %v92_v2 = vld [vmem:[%s1130_s0] sm:$0xff]  ;;  %v1010_v9 = vmov 1   ;;  %v93_v35 = vlaneseq }
  0x35   :  { %832 = vset.pattern.permute.xlu0 %v1008_v0  ;;  %834 = vset.pattern.permute.xlu1 %v1009_v1  ;;  %v105_v3 = vadd.s32 30, %v92_v2  ;;  %v836_v4 = vld [vmem:[#allocation2 + $0x74] ss:$8 sps:$4 sm:$0xff]   ;;  %v838_v5 = vld [vmem:[#allocation2 + $0x70] ss:$8 sps:$4 sm:$0xff]   ;;  %v99_v6 = vadd.s32 10, %v92_v2 }
  0x36   :  { %255 = vmatprep.mubr.bf16.mxu0 %v1008_v0  ;;  %96 = vperm.xlu0 %832, %v92_v2   ;;  %v839_v7 = vld [vmem:[#allocation2 + $0x64] ss:$8 sps:$4 sm:$0xff]   ;;  %v841_v8 = vld [vmem:[#allocation2 + $0x60] ss:$8 sps:$4 sm:$0xff]   ;;  %v842_v10 = vld [vmem:[#allocation2 + $0x54] ss:$8 sps:$4 sm:$0xff]  }
  0x37   :  { %107 = vperm.xlu1 %834, %v105_v3   ;;  %223 = vmatprep.subr.bf16.mxu0 %v836_v4  ;;  %v844_v11 = vld [vmem:[#allocation2 + $0x50] ss:$8 sps:$4 sm:$0xff]   ;;  %v845_v12 = vld [vmem:[#allocation2 + $0x44] ss:$8 sps:$4 sm:$0xff]   ;;  %v847_v13 = vld [vmem:[#allocation2 + $0x40] ss:$8 sps:$4 sm:$0xff]  }
  0x38   :  { %224 = vmatpush1.bf16.msra.mxu0 %v838_v5  ;;  %v848_v14 = vld [vmem:[#allocation2 + $0x34] ss:$8 sps:$4 sm:$0xff]   ;;  %v850_v17 = vld [vmem:[#allocation2 + $0x30] ss:$8 sps:$4 sm:$0xff]   ;;  %v864_v20 = vld [vmem:[#allocation5 + $0x68] sm:$0xff]   ;;  %v1011_v34 = vmov 0.0  }
  0x39   :  { %225 = vmatprep.subr.bf16.mxu0 %v839_v7  ;;  %v860_v15 = vld [vmem:[#allocation5 + $0x78] sm:$0xff]   ;;  %v862_v18 = vld [vmem:[#allocation5 + $0x70] sm:$0xff]   ;;  %v851_v21 = vld [vmem:[#allocation2 + $0x24] ss:$8 sps:$4 sm:$0xff]   ;;  %v94_v37 = vand.u32 127, %v93_v35  ;;  %v134_v53 = vshrl.u32 %v93_v35, 7 }
  0x3a   :  { %833 = vset.pattern.permute.xlu0 %v1010_v9  ;;  %v861_v16 = vld [vmem:[#allocation5 + $0x38] sm:$0xff]   ;;  %738 = vmatprep.subr.bf16.mxu1 %v860_v15  ;;  %v863_v19 = vld [vmem:[#allocation5 + $0x30] sm:$0xff]   ;;  %v853_v22 = vld [vmem:[#allocation2 + $0x20] ss:$8 sps:$4 sm:$0xff]   ;;  %vm1012_vm5 = vmmov 0   ;;  %s1013_s21 = smov [#allocation10]  }
  0x3b   :  { %101 = vperm.xlu0 %833, %v99_v6   ;;  %739 = vmatpush3.bf16.msra.mxu1 %v861_v16  ;;  %v865_v23 = vld [vmem:[#allocation5 + $0x28] sm:$0xff]   ;;  %v866_v24 = vld [vmem:[#allocation5 + $0x60] sm:$0xff]   ;;  %v854_v25 = vld [vmem:[#allocation2 + $0x14] ss:$8 sps:$4 sm:$0xff]   ;;  %v135_v54 = vsub.s32 0, %v134_v53  ;;  %v139_v56 = vsub.s32 1, %v134_v53 }
  0x3c   :  { %226 = vmatpush1.bf16.msra.mxu0 %v841_v8  ;;  %740 = vmatprep.subr.bf16.mxu1 %v862_v18  ;;  %v856_v26 = vld [vmem:[#allocation2 + $0x10] ss:$8 sps:$4 sm:$0xff]   ;;  %v857_v27 = vld [vmem:[#allocation2 + $0x4] ss:$8 sps:$4 sm:$0xff]   ;;  %v859_v31 = vld [vmem:[#allocation2] ss:$8 sps:$4 sm:$0xff]  }
  0x3d   :  { %227 = vmatprep.subr.bf16.mxu0 %v842_v10  ;;  %v867_v28 = vld [vmem:[#allocation5 + $0x20] sm:$0xff]   ;;  %v868_v29 = vld [vmem:[#allocation5 + $0x58] sm:$0xff]   ;;  %v870_v32 = vld [vmem:[#allocation5 + $0x50] sm:$0xff]   ;;  %s676_s22 = sshll.u32 %s1013_s21, 4  ;;  %s677_s22 = int_to_ptr.vmem [resolvable:$true] %s676_s22 }
  0x3e   :  { %v869_v30 = vld [vmem:[#allocation5 + $0x18] sm:$0xff]   ;;  %v871_v33 = vld [vmem:[#allocation5 + $0x10] sm:$0xff]   ;;  %v113_v41 = vld [vmem:[%s1131_s1] sm:$0xf]  ;;  %p977_p7 = scmp.lt.s32.totalorder %s677_s22, %s677_s22 }
  0x3f   :  { %835 = vset.pattern.permute.xlu0 %v1009_v1  ;;  %741 = vmatpush3.bf16.msra.mxu1 %v863_v19  ;;  %v872_v44 = vld [vmem:[#allocation5 + $0x48] sm:$0xff]   ;;  %v874_v46 = vld [vmem:[#allocation5 + $0x40] sm:$0xff]   ;;  %v876_v48 = vld [vmem:[#allocation7 + $0x38] sm:$0xff]  }
  0x40   :  { %228 = vmatpush1.bf16.msra.mxu0 %v844_v11  ;;  %742 = vmatprep.subr.bf16.mxu1 %v864_v20  ;;  %v873_v45 = vld [vmem:[#allocation5 + $0x8] sm:$0xff]   ;;  %v875_v47 = vld [vmem:[#allocation5] sm:$0xff]   ;;  %v877_v49 = vld [vmem:[#allocation7 + $0x30] sm:$0xff]  }
  0x41   :  { %229 = vmatprep.subr.bf16.mxu0 %v845_v12  ;;  %v878_v50 = vld [vmem:[#allocation7 + $0x28] sm:$0xff]   ;;  %v879_v51 = vld [vmem:[#allocation7 + $0x20] sm:$0xff]   ;;  %v880_v52 = vld [vmem:[#allocation7 + $0x18] sm:$0xff]  }
  0x42   :  { %v131_v55 = vld [vmem:[%s1133_s3] sm:$0x3]  ;;  %v881_v5 = vld [vmem:[#allocation7 + $0x10] sm:$0xff]   ;;  %v882_v6 = vld [vmem:[#allocation7 + $0x8] sm:$0xff]  }
  0x43   :  { %743 = vmatpush3.bf16.msra.mxu1 %v865_v23  ;;  %v136_v57 = vrot.slane %v131_v55, %v135_v54  ;;  %v140_v58 = vrot.slane %v131_v55, %v139_v56  ;;  %v883_v7 = vld [vmem:[#allocation7] sm:$0xff]   ;;  %v884_v8 = vld [vmem:[#allocation8 + $0x38] sm:$0xff]   ;;  %v885_v9 = vld [vmem:[#allocation8 + $0x30] sm:$0xff]  }
  0x44   :  { %230 = vmatpush1.bf16.msra.mxu0 %v847_v13  ;;  %744 = vmatprep.subr.bf16.mxu1 %v866_v24  ;;  %v886_v10 = vld [vmem:[#allocation8 + $0x28] sm:$0xff]   ;;  %v887_v11 = vld [vmem:[#allocation8 + $0x20] sm:$0xff]   ;;  %v888_v12 = vld [vmem:[#allocation8 + $0x18] sm:$0xff]  }
  0x45   :  { %231 = vmatprep.subr.bf16.mxu0 %v848_v14  ;;  %v889_v13 = vld [vmem:[#allocation8 + $0x10] sm:$0xff]   ;;  %v703_v15 = vld [vmem:[%s1135_s5] ss:$0 sm:$0xff]  ;;  %v890_v23 = vld [vmem:[#allocation8 + $0x8] sm:$0xff]  }
  0x46   :  { %v891_v24 = vld [vmem:[#allocation8] sm:$0xff]  }
  0x47   :  { %745 = vmatpush3.bf16.msra.mxu1 %v867_v28 }
  0x48   :  { %232 = vmatpush1.bf16.msra.mxu0 %v850_v17  ;;  %746 = vmatprep.subr.bf16.mxu1 %v868_v29 }
  0x49   :  { %233 = vmatprep.subr.bf16.mxu0 %v851_v21 }
  0x4b   :  { %747 = vmatpush3.bf16.msra.mxu1 %v869_v30 }
  0x4c   :  { %234 = vmatpush1.bf16.msra.mxu0 %v853_v22  ;;  %748 = vmatprep.subr.bf16.mxu1 %v870_v32 }
  0x4d   :  { %235 = vmatprep.subr.bf16.mxu0 %v854_v25  ;;  %v720_v25 = vld [vmem:[%s1137_s7] ss:$0 sm:$0xff]  ;;  %s972_s7 = scalar_lea.vmem %s677_s22, 128 }
  0x4e   :  { %p973_p6 = scmp.ne.s32.totalorder %s677_s22, %s972_s7  ;;  %p978_p8 = scmp.lt.s32.totalorder %s972_s7, %s972_s7 }
  0x4f   :  { %749 = vmatpush3.bf16.msra.mxu1 %v871_v33  ;;  %v729_v33 = vld [vmem:[%s1139_s9] ss:$0 sm:$0xff] }
  0x50   :  { %236 = vmatpush1.bf16.msra.mxu0 %v856_v26  ;;  %750 = vmatprep.subr.bf16.mxu1 %v872_v44  ;;  %p979_p9 = por %p978_p8, %p977_p7 }
  0x51   :  { %237 = vmatprep.subr.bf16.mxu0 %v857_v27 }
  0x52   :  { %p980_p10 = pnand %p979_p9, %p973_p6 }
  0x53   :  { %751 = vmatpush3.bf16.msra.mxu1 %v873_v45 }
  0x54   :  { %238 = vmatpush1.bf16.msra.mxu0 %v859_v31  ;;  %752 = vmatprep.subr.bf16.mxu1 %v874_v46 }
  0x55   :  { %778 = vmatprep.subr.bf16.mxu0 %v1011_v34 }
  0x57   :  { %753 = vmatpush3.bf16.msra.mxu1 %v875_v47 }
  0x58   :  { %798 = vmatprep.subr.bf16.mxu1 %v1011_v34 }
  0xb1   :  { %v97_v36 = vpop.permute.xlu0 %96 }
  0xb2   :  { %v108_v38 = vpop.permute.xlu1 %107  ;;  %vm98_vm1 = vcmp.eq.s32.totalorder %v94_v37, %v97_v36 }
  0xb3   :  { %vm109_vm0 = vcmp.eq.s32.totalorder %v94_v37, %v108_v38 }
  0xb6   :  { %v102_v39 = vpop.permute.xlu0 %101 }
  0xb7   :  { %vm103_vm2 = vcmp.eq.s32.totalorder %v94_v37, %v102_v39 }
  0xb8   :  { %vm104_vm3 = vmor %vm98_vm1, %vm103_vm2 }
  0xb9   :  { %vm110_vm4 = vmor %vm104_vm3, %vm109_vm0 }
  0xba   :  { %v111_v40 = vsel %vm110_vm4, 1.0, %v1011_v34 }
  0xbb   :  { %v112_v42 = vpack.c.bf16 %v111_v40, %v111_v40 }
  0xbd   :  { %v114_v43 = vadd.bf16 %v113_v41, %v112_v42 }
  0xbf   :  { %256 = vmatmul.mubr.bf16.vlgmr.msra.gmra.mxu0 %v114_v43 }
  0xc0   :  { %779 = vmatpush3.bf16.msra.mxu0 %v876_v48  ;;  %794 = vmatprep.mubr.msk.bf16.mxu0 %vm1012_vm5, %v1011_v34 }
  0xc1   :  { %780 = vmatprep.subr.bf16.mxu0 %v1011_v34 }
  0xc4   :  { %781 = vmatpush3.bf16.msra.mxu0 %v877_v49 }
  0xc5   :  { %782 = vmatprep.subr.bf16.mxu0 %v1011_v34 }
  0xc8   :  { %783 = vmatpush3.bf16.msra.mxu0 %v878_v50 }
  0xc9   :  { %784 = vmatprep.subr.bf16.mxu0 %v1011_v34 }
  0xcc   :  { %785 = vmatpush3.bf16.msra.mxu0 %v879_v51 }
  0xcd   :  { %786 = vmatprep.subr.bf16.mxu0 %v1011_v34 }
  0xd0   :  { %787 = vmatpush3.bf16.msra.mxu0 %v880_v52 }
  0xd1   :  { %788 = vmatprep.subr.bf16.mxu0 %v1011_v34 }
  0xd4   :  { %789 = vmatpush3.bf16.msra.mxu0 %v881_v5 }
  0xd5   :  { %790 = vmatprep.subr.bf16.mxu0 %v1011_v34 }
  0xd8   :  { %791 = vmatpush3.bf16.msra.mxu0 %v882_v6 }
  0xd9   :  { %792 = vmatprep.subr.bf16.mxu0 %v1011_v34 }
  0xdc   :  { %793 = vmatpush3.bf16.msra.mxu0 %v883_v7 }
 0x17f   :  { %v257_v59 = vpop.f32.mrf.mxu0 }
 0x180   :  { %v258_v60 = vadd.f32 %v257_v59, %v136_v57 }
 0x181   :  { %v259_v61 = vpop.f32.mrf.mxu0 }
 0x182   :  { %v260_v62 = vadd.f32 %v259_v61, %v140_v58  ;;  %v264_v63 = vmax.f32 %v258_v60, 0.0 }
 0x183   :  { %v261_v0 = vpop.f32.mrf.mxu0 }
 0x184   :  { %v265_v1 = vmax.f32 %v260_v62, 0.0  ;;  %v266_v4 = vpack.c.bf16 %v264_v63, %v264_v63 }
 0x185   :  { %v262_v2 = vpop.f32.mrf.mxu0 }
 0x186   :  { %v267_v3 = vpack.c.bf16 %v265_v1, %v265_v1 }
 0x188   :  { %435 = vmatprep.mubr.bf16.mxu1 %v267_v3 }
 0x189   :  { %436 = vmatmul.mubr.bf16.vlgmr.msra.gmra.mxu1 %v266_v4 }
 0x18a   :  { %814 = vmatprep.mubr.msk.bf16.mxu1 %vm1012_vm5, %v1011_v34  ;;  %799 = vmatpush3.bf16.msra.mxu1 %v884_v8 }
 0x18b   :  { %800 = vmatprep.subr.bf16.mxu1 %v1011_v34 }
 0x18e   :  { %801 = vmatpush3.bf16.msra.mxu1 %v885_v9 }
 0x18f   :  { %802 = vmatprep.subr.bf16.mxu1 %v1011_v34 }
 0x192   :  { %803 = vmatpush3.bf16.msra.mxu1 %v886_v10 }
 0x193   :  { %804 = vmatprep.subr.bf16.mxu1 %v1011_v34 }
 0x196   :  { %805 = vmatpush3.bf16.msra.mxu1 %v887_v11 }
 0x197   :  { %806 = vmatprep.subr.bf16.mxu1 %v1011_v34 }
 0x19a   :  { %807 = vmatpush3.bf16.msra.mxu1 %v888_v12 }
 0x19b   :  { %808 = vmatprep.subr.bf16.mxu1 %v1011_v34 }
 0x19e   :  { %809 = vmatpush3.bf16.msra.mxu1 %v889_v13 }
 0x19f   :  { %810 = vmatprep.subr.bf16.mxu1 %v1011_v34 }
 0x1a2   :  { %811 = vmatpush3.bf16.msra.mxu1 %v890_v23 }
 0x1a3   :  { %812 = vmatprep.subr.bf16.mxu1 %v1011_v34 }
 0x1a6   :  { %813 = vmatpush3.bf16.msra.mxu1 %v891_v24 }
 0x249   :  { %v754_v14 = vpop.f32.mrf.mxu1 }
 0x24b   :  { %v755_v16 = vpop.f32.mrf.mxu1 }
 0x24c   :  { %v756_v17 = vadd.f32 %v755_v16, %v754_v14 }
 0x24d   :  { %v757_v18 = vpop.f32.mrf.mxu1 }
 0x24e   :  { %v438_v19 = vadd.f32 %v756_v17, %v703_v15 }
 0x24f   :  { %v758_v20 = vpop.f32.mrf.mxu1 }
 0x250   :  { %v443_v21 = vmax.f32 %v438_v19, 0.0 }
 0x252   :  { %v444_v22 = vpack.c.bf16 %v443_v21, %v443_v21 }
 0x254   :  { %795 = vmatmul.mubr.bf16.vlgmr.msra.gmra.mxu0 %v444_v22 }
 0x314   :  { %v550_v26 = vpop.f32.mrf.mxu0 }
 0x315   :  { %v551_v27 = vadd.f32 %v720_v25, %v550_v26 }
 0x316   :  { %v796_v28 = vpop.f32.mrf.mxu0 }
 0x317   :  { %v556_v29 = vmax.f32 %v551_v27, 0.0 }
 0x318   :  { %v553_v30 = vpop.f32.mrf.mxu0 }
 0x319   :  { %v557_v31 = vpack.c.bf16 %v556_v29, %v556_v29 }
 0x31a   :  { %v797_v32 = vpop.f32.mrf.mxu0 }
 0x31b   :  { %815 = vmatmul.mubr.bf16.vlgmr.msra.gmra.mxu1 %v557_v31 }
 0x3db   :  { %v663_v34 = vpop.f32.mrf.mxu1 }
 0x3dc   :  { %v664_v35 = vadd.f32 %v729_v33, %v663_v34 }
 0x3dd   :  { %v816_v36 = vpop.f32.mrf.mxu1 }
 0x3de   :  { %669 = vst [vmem:[#allocation10] sm:$0xff] %v664_v35 }
 0x3df   :  { %v666_v37 = vpop.f32.mrf.mxu1 }
 0x3e0   :  { %983 = shalt.err (!%p980_p10)
}
 0x3e1   :  { %679 = dma.vmem_to_hbm [thread:$0]  %s677_s22, 128, %s1140_s10, [#allocation4]   ;;  %v817_v38 = vpop.f32.mrf.mxu1 }
 0x3e2   :  { %998 = dma.done.wait [#allocation4], 128  }
 0x3e3   :  { %999 = vsyncadd [#allocation4], 4294967168 }
 0x3e4   :  { %683 = vsyncpa [#allocation3], 1 }
 0x3e5   :  { %684 = vsyncpa [#allocation6], 1 }
 0x3e6   :  { %685 = vsyncpa [#allocation9], 1 }
 0x3e7   :  { %686 = vsyncpa [#allocation4], 1 }

</bundles_post_ra>
